<compile_context>
chip_gen: v5e
topology: v5e:2x2
jax: 0.10.0
libtpu: 0.0.40
codegen_flags: <defaults>
</compile_context>

<pallas_src>
import jax
import jax.numpy as jnp
from jax.experimental import pallas as pl
from jax.experimental.pallas import tpu as pltpu


OUT_H, OUT_W = 4, 4
OUT_HW = OUT_H * OUT_W
_LANE = 128


def _round_up(x: int, m: int) -> int:
    return ((x + m - 1) // m) * m


def _sublane_mult(itemsize: int) -> int:
    # Sub-32-bit dtypes pack along sublanes: 8 rows (4B), 16 (2B), 32 (1B).
    return 8 * max(1, 4 // max(1, itemsize))


def _padded_bytes(rows: int, cols: int, itemsize: int) -> int:
    # A VMEM block pads its last dim to 128 lanes and its second-last dim to
    # the dtype's sublane pack.
    return _round_up(rows, _sublane_mult(itemsize)) * _round_up(cols, _LANE) * itemsize


def _vmem_capacity_bytes() -> int:
    """Per-core VMEM capacity; conservative fallback = v7x's 64 MiB/TC."""
    default = 64 * 1024 * 1024
    try:
        info = pltpu.get_tpu_info()
    except Exception:
        return default
    for name in ("vmem_capacity_bytes", "vmem_size_bytes", "vmem_bytes"):
        v = getattr(info, name, None)
        if isinstance(v, int) and v > 0:
            return v
    return default


def _bin_membership(in_size: int, out_size: int):
    """0/1 membership matrix (out_size, in_size) and per-bin lengths (out_size,)."""
    o = jnp.arange(out_size)
    starts = (o * in_size) // out_size                  # floor(i * in / out)
    ends = -((-(o + 1) * in_size) // out_size)          # ceil((i+1) * in / out)
    idx = jnp.arange(in_size)
    mask = (idx[None, :] >= starts[:, None]) & (idx[None, :] < ends[:, None])
    return mask.astype(jnp.float32), (ends - starts).astype(jnp.float32)


def _plan_tiles(b: int, hw: int, itemsize: int, budget: int, k_tile_override=None):
    """Pick (b_tile, k_tile, m_single_buffered) from *lane/sublane-padded* VMEM sizes."""
    row_mult = _sublane_mult(itemsize)

    def max_rows(k_tile: int, m_bufs: int) -> int:
        fixed = (m_bufs * _padded_bytes(k_tile, OUT_HW, itemsize)   # pooling matrix
                 + 2 * _padded_bytes(1, OUT_HW, 4))                 # f32 scale (dbl buf)
        per_row = (2 * _round_up(k_tile, _LANE) * itemsize          # input, double buf
                   + 2 * _LANE * itemsize                           # output, double buf
                   + _LANE * 4)                                     # f32 accumulator
        return max(0, (budget - fixed) // per_row)

    if k_tile_override is not None:
        k_tile = _round_up(int(k_tile_override), _LANE)
        k_steps = max(1, -(-hw // k_tile))
        m_single = k_steps == 1
        rows = max_rows(k_tile, 1 if m_single else 2)
    else:
        # Preferred: whole reduction axis in one block; M fetched exactly once.
        k_tile, m_single = hw, True
        rows = max_rows(hw, 1)
        if rows < row_mult:
            # Large-image fallback: tile the reduction axis too.
            k_tile, m_single = 8 * 1024, False
            rows = max_rows(k_tile, 2)

    rows = max(rows, row_mult)
    if rows >= 256:
        align = 256
    elif rows >= 128:
        align = 128
    else:
        align = row_mult
    b_tile = (rows // align) * align

    b_needed = _round_up(b, row_mult)
    b_tile = min(b_tile, b_needed)
    # Keep >=2 B steps when possible so v7x's two TensorCores both get work.
    if b_tile >= b_needed and b_needed >= 2 * row_mult:
        b_tile = _round_up(-(-b_needed // 2), row_mult)
    return b_tile, k_tile, m_single


def _avgpool_kernel(x_ref, m_ref, s_ref, o_ref, acc_ref):
    # x_ref: (b_tile, k_tile)    m_ref: (k_tile, 16) 0/1 membership in x.dtype
    # s_ref: (1, 16) f32 per-bin 1/area        o_ref: (b_tile, 16)
    # acc_ref: (b_tile, 16) f32 accumulator, resident across the k axis.
    k = pl.program_id(1)

    @pl.when(k == 0)
    def _():
        acc_ref[...] = jnp.zeros_like(acc_ref)

    acc_ref[...] += jnp.dot(
        x_ref[...], m_ref[...], preferred_element_type=jnp.float32
    )

    @pl.when(k == pl.num_programs(1) - 1)
    def _():
        o_ref[...] = (acc_ref[...] * s_ref[...]).astype(o_ref.dtype)


def _pallas_pool(xf, m, scale, out_dtype, b_tile, k_tile, m_single_buffered,
                 vmem_limit_bytes, cost):
    b, hw_pad = xf.shape
    b_steps = pl.cdiv(b, b_tile)
    k_steps = hw_pad // k_tile

    m_kwargs = {}
    if m_single_buffered:
        m_kwargs["pipeline_mode"] = pl.Buffered(1)   # fetched exactly once

    return pl.pallas_call(
        _avgpool_kernel,
        out_shape=jax.ShapeDtypeStruct((b, OUT_HW), out_dtype),
        grid_spec=pltpu.PrefetchScalarGridSpec(
            num_scalar_prefetch=0,
            grid=(b_steps, k_steps),
            in_specs=[
                pl.BlockSpec((b_tile, k_tile), lambda i, k: (i, k)),
                pl.BlockSpec((k_tile, OUT_HW), lambda i, k: (k, 0), **m_kwargs),
                pl.BlockSpec((1, OUT_HW), lambda i, k: (0, 0)),
            ],
            out_specs=pl.BlockSpec((b_tile, OUT_HW), lambda i, k: (i, 0)),
            scratch_shapes=[pltpu.VMEM((b_tile, OUT_HW), jnp.float32)],
        ),
        compiler_params=pltpu.CompilerParams(
            dimension_semantics=("parallel", "arbitrary"),
            vmem_limit_bytes=vmem_limit_bytes,
        ),
        cost_estimate=cost,
    )(xf, m, scale)


def adaptive_avg_pool_4x4(x: jax.Array, *, k_tile=None) -> jax.Array:
    """x: (N, C, H, W) -> (N, C, 4, 4), matching nn.AdaptiveAvgPool2d((4, 4))."""
    n, c, h, w = x.shape
    b = n * c
    hw = h * w
    itemsize = jnp.dtype(x.dtype).itemsize

    xf = x.reshape(b, hw)                               # row-major: h * W + w

    ph, len_h = _bin_membership(h, OUT_H)               # (4, H), (4,)
    pw, len_w = _bin_membership(w, OUT_W)               # (4, W), (4,)
    # m[h*W + w, oh*4 + ow] = [h in bin oh] * [w in bin ow]  ==  kron(ph, pw).T
    m = jnp.kron(ph, pw).T.astype(x.dtype)              # (H*W, 16), exact 0/1 values
    scale = (1.0 / (len_h[:, None] * len_w[None, :])).reshape(1, OUT_HW)
    scale = scale.astype(jnp.float32)

    capacity = _vmem_capacity_bytes()
    budget = (capacity * 3) // 4                        # headroom for compiler scratch
    b_tile, k_tile, m_single = _plan_tiles(b, hw, itemsize, budget, k_tile)

    k_steps = max(1, -(-hw // k_tile))
    hw_pad = k_steps * k_tile
    if hw_pad > hw:
        # Zero-pad the reduction axis so the ragged tail contributes exactly 0.
        xf = jnp.pad(xf, ((0, 0), (0, hw_pad - hw)))
        m = jnp.pad(m, ((0, hw_pad - hw), (0, 0)))

    m_bufs = 1 if m_single else 2
    footprint = (2 * _padded_bytes(b_tile, k_tile, itemsize)        # input slab
                 + m_bufs * _padded_bytes(k_tile, OUT_HW, itemsize)  # pooling matrix
                 + 2 * _padded_bytes(1, OUT_HW, 4)                   # scale
                 + 2 * _padded_bytes(b_tile, OUT_HW, itemsize)       # output
                 + _padded_bytes(b_tile, OUT_HW, 4))                 # accumulator
    vmem_limit = int(min(capacity, footprint + (8 << 20)))
    vmem_limit = max(vmem_limit, min(capacity, 32 * 1024 * 1024))

    cost = pl.CostEstimate(
        flops=2 * b * hw * OUT_HW,
        transcendentals=0,
        bytes_accessed=(b * hw + hw_pad * OUT_HW + b * OUT_HW) * itemsize,
    )

    if m_single:
        try:
            out = _pallas_pool(xf, m, scale, x.dtype, b_tile, k_tile, True,
                               vmem_limit, cost)
        except Exception:
            # pl.Buffered(1) unsupported on this JAX build: default double buffer.
            out = _pallas_pool(xf, m, scale, x.dtype, b_tile, k_tile, False,
                               vmem_limit, cost)
    else:
        out = _pallas_pool(xf, m, scale, x.dtype, b_tile, k_tile, False,
                           vmem_limit, cost)

    return out.reshape(n, c, OUT_H, OUT_W)


if __name__ == "__main__":
    key = jax.random.PRNGKey(0)
    x = jax.random.normal(key, (2, 4, 16, 16), dtype=jnp.float32)

    y = adaptive_avg_pool_4x4(x)
    jax.block_until_ready(y)

    # Reference: 16 -> 4 means uniform 4x4 bins.
    ref = x.reshape(2, 4, 4, 4, 4, 4).mean(axis=(3, 5))
    assert y.shape == (2, 4, 4, 4), y.shape
    assert jnp.allclose(y, ref, atol=1e-5), float(jnp.max(jnp.abs(y - ref)))

    # Same input through the K-tiled (reduction-axis accumulator) path.
    y_kt = adaptive_avg_pool_4x4(x, k_tile=128)
    jax.block_until_ready(y_kt)
    assert jnp.allclose(y_kt, ref, atol=1e-5), float(jnp.max(jnp.abs(y_kt - ref)))

    # Odd sizes: non-uniform adaptive bins and B (=3) below the sublane pack.
    x2 = jax.random.normal(jax.random.PRNGKey(1), (1, 3, 7, 10), dtype=jnp.float32)
    y2 = adaptive_avg_pool_4x4(x2)
    jax.block_until_ready(y2)
    ph2, lh2 = _bin_membership(7, OUT_H)
    pw2, lw2 = _bin_membership(10, OUT_W)
    ref2 = jnp.einsum("oh,nchw,pw->ncop", ph2 / lh2[:, None], x2, pw2 / lw2[:, None])
    assert y2.shape == (1, 3, 4, 4), y2.shape
    assert jnp.allclose(y2, ref2, atol=1e-5), float(jnp.max(jnp.abs(y2 - ref2)))

    # bf16 input: 0/1 membership matrix + f32 scale keeps f32-accumulated accuracy.
    yb = adaptive_avg_pool_4x4(x.astype(jnp.bfloat16))
    jax.block_until_ready(yb)
    assert yb.dtype == jnp.bfloat16
    assert jnp.allclose(yb.astype(jnp.float32), ref, atol=2e-2, rtol=2e-2)

    print("KERNEL_OK")
</pallas_src>

<mosaic_0001>
module attributes {stable_mosaic.version = 11 : i64} {
  func.func @_avgpool_kernel(%arg0: i32, %arg1: i32, %arg2: memref<8x256xf32, #tpu.memory_space<vmem>>, %arg3: memref<256x16xf32, #tpu.memory_space<vmem>>, %arg4: memref<1x16xf32, #tpu.memory_space<vmem>>, %arg5: memref<8x16xf32, #tpu.memory_space<vmem>>, %arg6: memref<8x16xf32, #tpu.memory_space<vmem>>) attributes {dimension_semantics = [#tpu.dimension_semantics<parallel>, #tpu.dimension_semantics<arbitrary>], iteration_bounds = array<i64: 1, 1>, scalar_prefetch = 0 : i64, scratch_operands = 1 : i64, tpu.core_type = #tpu.core_type<tc>, window_params = [{transform_indices = @transform_0, window_bounds = array<i64: 8, 256>}, {pipeline_mode = #tpu.pipeline_mode<synchronous>, transform_indices = @transform_1, window_bounds = array<i64: 256, 16>}, {pipeline_mode = #tpu.pipeline_mode<synchronous>, transform_indices = @transform_2, window_bounds = array<i64: 1, 16>}, {transform_indices = @transform_3, window_bounds = array<i64: 8, 16>}]} {
    %c0_i32 = arith.constant 0 : i32
    %0 = arith.cmpi eq, %arg1, %c0_i32 : i32
    %1 = arith.extui %0 : i1 to i32
    %c0_i32_0 = arith.constant 0 : i32
    %2 = arith.cmpi ne, %1, %c0_i32_0 : i32
    scf.if %2 {
      %cst_10 = arith.constant 0.000000e+00 : f32
      %12 = vector.broadcast %cst_10 : f32 to vector<8x16xf32>
      %c0_11 = arith.constant 0 : index
      %c0_12 = arith.constant 0 : index
      %13 = vector.load %arg6[%c0_11, %c0_12] : memref<8x16xf32, #tpu.memory_space<vmem>>, vector<8x16xf32>
      tpu.vector_store %arg6[%c0_11, %c0_12], %12 {strides = array<i32>} : memref<8x16xf32, #tpu.memory_space<vmem>>, vector<8x16xf32>,
    } else {
    }
    %c0 = arith.constant 0 : index
    %c0_1 = arith.constant 0 : index
    %3 = vector.load %arg6[%c0, %c0_1] : memref<8x16xf32, #tpu.memory_space<vmem>>, vector<8x16xf32>
    %c0_2 = arith.constant 0 : index
    %c0_3 = arith.constant 0 : index
    %4 = vector.load %arg2[%c0_2, %c0_3] : memref<8x256xf32, #tpu.memory_space<vmem>>, vector<8x256xf32>
    %c0_4 = arith.constant 0 : index
    %c0_5 = arith.constant 0 : index
    %5 = vector.load %arg3[%c0_4, %c0_5] : memref<256x16xf32, #tpu.memory_space<vmem>>, vector<256x16xf32>
    %cst = arith.constant dense<0.000000e+00> : vector<8x16xf32>
    %6 = tpu.matmul %4, %5, %cst {dimension_numbers = #tpu.dot_dimension_numbers<[1], [0], [0], [1], [0, 0, 1, 1], [], []>} : vector<8x256xf32>, vector<256x16xf32>, vector<8x16xf32> -> vector<8x16xf32>
    %7 = arith.addf %3, %6 : vector<8x16xf32>
    %c0_6 = arith.constant 0 : index
    %c0_7 = arith.constant 0 : index
    %8 = vector.load %arg6[%c0_6, %c0_7] : memref<8x16xf32, #tpu.memory_space<vmem>>, vector<8x16xf32>
    tpu.vector_store %arg6[%c0_6, %c0_7], %7 {strides = array<i32>} : memref<8x16xf32, #tpu.memory_space<vmem>>, vector<8x16xf32>,
    %c0_i32_8 = arith.constant 0 : i32
    %9 = arith.cmpi eq, %arg1, %c0_i32_8 : i32
    %10 = arith.extui %9 : i1 to i32
    %c0_i32_9 = arith.constant 0 : i32
    %11 = arith.cmpi ne, %10, %c0_i32_9 : i32
    scf.if %11 {
      %c0_10 = arith.constant 0 : index
      %c0_11 = arith.constant 0 : index
      %12 = vector.load %arg6[%c0_10, %c0_11] : memref<8x16xf32, #tpu.memory_space<vmem>>, vector<8x16xf32>
      %c0_12 = arith.constant 0 : index
      %c0_13 = arith.constant 0 : index
      %13 = vector.load %arg4[%c0_12, %c0_13] : memref<1x16xf32, #tpu.memory_space<vmem>>, vector<1x16xf32>
      %14 = vector.broadcast %13 : vector<1x16xf32> to vector<8x16xf32>
      %15 = arith.mulf %12, %14 : vector<8x16xf32>
      %c0_14 = arith.constant 0 : index
      %c0_15 = arith.constant 0 : index
      %16 = vector.load %arg5[%c0_14, %c0_15] : memref<8x16xf32, #tpu.memory_space<vmem>>, vector<8x16xf32>
      tpu.vector_store %arg5[%c0_14, %c0_15], %15 {strides = array<i32>} : memref<8x16xf32, #tpu.memory_space<vmem>>, vector<8x16xf32>,
    } else {
    }
    return
  }
  func.func @transform_0(%arg0: i32, %arg1: i32) -> (i32, i32) {
    %c0_i32 = arith.constant 0 : i32
    return %arg0, %arg1 : i32, i32
  }
  func.func @transform_1(%arg0: i32, %arg1: i32) -> (i32, i32) {
    %c0_i32 = arith.constant 0 : i32
    %c0_i32_0 = arith.constant 0 : i32
    return %arg1, %c0_i32 : i32, i32
  }
  func.func @transform_2(%arg0: i32, %arg1: i32) -> (i32, i32) {
    %c0_i32 = arith.constant 0 : i32
    %c0_i32_0 = arith.constant 0 : i32
    %c0_i32_1 = arith.constant 0 : i32
    return %c0_i32, %c0_i32_0 : i32, i32
  }
  func.func @transform_3(%arg0: i32, %arg1: i32) -> (i32, i32) {
    %c0_i32 = arith.constant 0 : i32
    %c0_i32_0 = arith.constant 0 : i32
    return %arg0, %c0_i32 : i32, i32
  }
}

module attributes {stable_mosaic.version = 11 : i64} {
  func.func @_avgpool_kernel(%arg0: i32, %arg1: i32, %arg2: memref<8x256xf32, #tpu.memory_space<vmem>>, %arg3: memref<256x16xf32, #tpu.memory_space<vmem>>, %arg4: memref<1x16xf32, #tpu.memory_space<vmem>>, %arg5: memref<8x16xf32, #tpu.memory_space<vmem>>, %arg6: memref<8x16xf32, #tpu.memory_space<vmem>>) attributes {dimension_semantics = [#tpu.dimension_semantics<parallel>, #tpu.dimension_semantics<arbitrary>], iteration_bounds = array<i64: 1, 1>, scalar_prefetch = 0 : i64, scratch_operands = 1 : i64, tpu.core_type = #tpu.core_type<tc>, window_params = [{transform_indices = @transform_0, window_bounds = array<i64: 8, 256>}, {transform_indices = @transform_1, window_bounds = array<i64: 256, 16>}, {pipeline_mode = #tpu.pipeline_mode<synchronous>, transform_indices = @transform_2, window_bounds = array<i64: 1, 16>}, {transform_indices = @transform_3, window_bounds = array<i64: 8, 16>}]} {
    %c0_i32 = arith.constant 0 : i32
    %0 = arith.cmpi eq, %arg1, %c0_i32 : i32
    %1 = arith.extui %0 : i1 to i32
    %c0_i32_0 = arith.constant 0 : i32
    %2 = arith.cmpi ne, %1, %c0_i32_0 : i32
    scf.if %2 {
      %cst_10 = arith.constant 0.000000e+00 : f32
      %12 = vector.broadcast %cst_10 : f32 to vector<8x16xf32>
      %c0_11 = arith.constant 0 : index
      %c0_12 = arith.constant 0 : index
      %13 = vector.load %arg6[%c0_11, %c0_12] : memref<8x16xf32, #tpu.memory_space<vmem>>, vector<8x16xf32>
      tpu.vector_store %arg6[%c0_11, %c0_12], %12 {strides = array<i32>} : memref<8x16xf32, #tpu.memory_space<vmem>>, vector<8x16xf32>,
    } else {
    }
    %c0 = arith.constant 0 : index
    %c0_1 = arith.constant 0 : index
    %3 = vector.load %arg6[%c0, %c0_1] : memref<8x16xf32, #tpu.memory_space<vmem>>, vector<8x16xf32>
    %c0_2 = arith.constant 0 : index
    %c0_3 = arith.constant 0 : index
    %4 = vector.load %arg2[%c0_2, %c0_3] : memref<8x256xf32, #tpu.memory_space<vmem>>, vector<8x256xf32>
    %c0_4 = arith.constant 0 : index
    %c0_5 = arith.constant 0 : index
    %5 = vector.load %arg3[%c0_4, %c0_5] : memref<256x16xf32, #tpu.memory_space<vmem>>, vector<256x16xf32>
    %cst = arith.constant dense<0.000000e+00> : vector<8x16xf32>
    %6 = tpu.matmul %4, %5, %cst {dimension_numbers = #tpu.dot_dimension_numbers<[1], [0], [0], [1], [0, 0, 1, 1], [], []>} : vector<8x256xf32>, vector<256x16xf32>, vector<8x16xf32> -> vector<8x16xf32>
    %7 = arith.addf %3, %6 : vector<8x16xf32>
    %c0_6 = arith.constant 0 : index
    %c0_7 = arith.constant 0 : index
    %8 = vector.load %arg6[%c0_6, %c0_7] : memref<8x16xf32, #tpu.memory_space<vmem>>, vector<8x16xf32>
    tpu.vector_store %arg6[%c0_6, %c0_7], %7 {strides = array<i32>} : memref<8x16xf32, #tpu.memory_space<vmem>>, vector<8x16xf32>,
    %c0_i32_8 = arith.constant 0 : i32
    %9 = arith.cmpi eq, %arg1, %c0_i32_8 : i32
    %10 = arith.extui %9 : i1 to i32
    %c0_i32_9 = arith.constant 0 : i32
    %11 = arith.cmpi ne, %10, %c0_i32_9 : i32
    scf.if %11 {
      %c0_10 = arith.constant 0 : index
      %c0_11 = arith.constant 0 : index
      %12 = vector.load %arg6[%c0_10, %c0_11] : memref<8x16xf32, #tpu.memory_space<vmem>>, vector<8x16xf32>
      %c0_12 = arith.constant 0 : index
      %c0_13 = arith.constant 0 : index
      %13 = vector.load %arg4[%c0_12, %c0_13] : memref<1x16xf32, #tpu.memory_space<vmem>>, vector<1x16xf32>
      %14 = vector.broadcast %13 : vector<1x16xf32> to vector<8x16xf32>
      %15 = arith.mulf %12, %14 : vector<8x16xf32>
      %c0_14 = arith.constant 0 : index
      %c0_15 = arith.constant 0 : index
      %16 = vector.load %arg5[%c0_14, %c0_15] : memref<8x16xf32, #tpu.memory_space<vmem>>, vector<8x16xf32>
      tpu.vector_store %arg5[%c0_14, %c0_15], %15 {strides = array<i32>} : memref<8x16xf32, #tpu.memory_space<vmem>>, vector<8x16xf32>,
    } else {
    }
    return
  }
  func.func @transform_0(%arg0: i32, %arg1: i32) -> (i32, i32) {
    %c0_i32 = arith.constant 0 : i32
    return %arg0, %arg1 : i32, i32
  }
  func.func @transform_1(%arg0: i32, %arg1: i32) -> (i32, i32) {
    %c0_i32 = arith.constant 0 : i32
    %c0_i32_0 = arith.constant 0 : i32
    return %arg1, %c0_i32 : i32, i32
  }
  func.func @transform_2(%arg0: i32, %arg1: i32) -> (i32, i32) {
    %c0_i32 = arith.constant 0 : i32
    %c0_i32_0 = arith.constant 0 : i32
    %c0_i32_1 = arith.constant 0 : i32
    return %c0_i32, %c0_i32_0 : i32, i32
  }
  func.func @transform_3(%arg0: i32, %arg1: i32) -> (i32, i32) {
    %c0_i32 = arith.constant 0 : i32
    %c0_i32_0 = arith.constant 0 : i32
    return %arg0, %c0_i32 : i32, i32
  }
}

</mosaic_0001>

<bundles_post_ra>
// kernel: tpu_custom_call.1
= control target key start
LH: loop header
LB: loop body
LE: loop exit
PB: predicated region body
PF: predicated region fallthrough
CT: control target
= control target key end

     0   :  { %s287_s0 = inlined_call_operand.vmem [shape: f32[8,256], index: 0, kind: input, shape index: {}]   ;;  %s288_s1 = inlined_call_operand.vmem [shape: f32[256,16], index: 1, kind: input, shape index: {}]   ;;  %s289_s2 = inlined_call_operand.vmem [shape: f32[1,16], index: 2, kind: input, shape index: {}]   ;;  %s290_s3 = inlined_call_operand.hbm [shape: f32[8,16], index: 3, kind: output, shape index: {}]  }
   0x1   :  { %v39_v0 = vld [vmem:[%s288_s1 + $0x78] sm:$0xff]  ;;  %v38_v2 = vld [vmem:[%s288_s1 + $0x70] sm:$0xff]  ;;  %v37_v4 = vld [vmem:[%s288_s1 + $0x68] sm:$0xff] }
   0x2   :  { %v55_v1 = vld [vmem:[%s288_s1 + $0xf8] sm:$0xff]  ;;  %56 = vmatpush.msra.mxu0 %v39_v0  ;;  %v54_v3 = vld [vmem:[%s288_s1 + $0xf0] sm:$0xff]  ;;  %v53_v5 = vld [vmem:[%s288_s1 + $0xe8] sm:$0xff] }
   0x3   :  { %76 = vmatpush.msra.mxu1 %v55_v1  ;;  %v36_v6 = vld [vmem:[%s288_s1 + $0x60] sm:$0xff]  ;;  %v35_v8 = vld [vmem:[%s288_s1 + $0x58] sm:$0xff]  ;;  %v34_v10 = vld [vmem:[%s288_s1 + $0x50] sm:$0xff] }
   0x4   :  { %57 = vmatpush.msra.mxu0 %v38_v2  ;;  %v52_v7 = vld [vmem:[%s288_s1 + $0xe0] sm:$0xff]  ;;  %v51_v9 = vld [vmem:[%s288_s1 + $0xd8] sm:$0xff]  ;;  %v50_v11 = vld [vmem:[%s288_s1 + $0xd0] sm:$0xff] }
   0x5   :  { %77 = vmatpush.msra.mxu1 %v54_v3  ;;  %v33_v12 = vld [vmem:[%s288_s1 + $0x48] sm:$0xff] }
   0x6   :  { %58 = vmatpush.msra.mxu0 %v37_v4  ;;  %v49_v13 = vld [vmem:[%s288_s1 + $0xc8] sm:$0xff] }
   0x7   :  { %78 = vmatpush.msra.mxu1 %v53_v5 }
   0x8   :  { %59 = vmatpush.msra.mxu0 %v36_v6 }
   0x9   :  { %79 = vmatpush.msra.mxu1 %v52_v7 }
   0xa   :  { %60 = vmatpush.msra.mxu0 %v35_v8 }
   0xb   :  { %80 = vmatpush.msra.mxu1 %v51_v9 }
   0xc   :  { %61 = vmatpush.msra.mxu0 %v34_v10 }
   0xd   :  { %81 = vmatpush.msra.mxu1 %v50_v11 }
   0xe   :  { %8 = vsyncpa [#allocation4], 0  ;;  %v32_v14 = vld [vmem:[%s288_s1 + $0x40] sm:$0xff]  ;;  %62 = vmatpush.msra.mxu0 %v33_v12  ;;  %v31_v16 = vld [vmem:[%s288_s1 + $0x38] sm:$0xff]  ;;  %vm19_vm0 = vcmask 130048   ;;  %v154_v34 = vmov 0.0  }
   0xf   :  { %v48_v15 = vld [vmem:[%s288_s1 + $0xc0] sm:$0xff]  ;;  %82 = vmatpush.msra.mxu1 %v49_v13  ;;  %v47_v17 = vld [vmem:[%s288_s1 + $0xb8] sm:$0xff]  ;;  %v30_v18 = vld [vmem:[%s288_s1 + $0x30] sm:$0xff]  ;;  %20 = vst.msk [vmem:[#allocation2] sm:$0xff] %vm19_vm0, %v154_v34  ;;  %s116_s30 = sshll.u32 %s290_s3, 4  ;;  %s117_s30 = int_to_ptr.hbm [resolvable:$true] %s116_s30 }
  0x10   :  { %63 = vmatpush.msra.mxu0 %v32_v14  ;;  %v46_v19 = vld [vmem:[%s288_s1 + $0xb0] sm:$0xff]  ;;  %v29_v20 = vld [vmem:[%s288_s1 + $0x28] sm:$0xff]  ;;  %v28_v22 = vld [vmem:[%s288_s1 + $0x20] sm:$0xff] }
  0x11   :  { %83 = vmatpush.msra.mxu1 %v48_v15  ;;  %v45_v21 = vld [vmem:[%s288_s1 + $0xa8] sm:$0xff]  ;;  %v44_v23 = vld [vmem:[%s288_s1 + $0xa0] sm:$0xff]  ;;  %v27_v24 = vld [vmem:[%s288_s1 + $0x18] sm:$0xff] }
  0x12   :  { %64 = vmatpush.msra.mxu0 %v31_v16  ;;  %v43_v25 = vld [vmem:[%s288_s1 + $0x98] sm:$0xff]  ;;  %v26_v26 = vld [vmem:[%s288_s1 + $0x10] sm:$0xff]  ;;  %v25_v28 = vld [vmem:[%s288_s1 + $0x8] sm:$0xff] }
  0x13   :  { %84 = vmatpush.msra.mxu1 %v47_v17  ;;  %v42_v27 = vld [vmem:[%s288_s1 + $0x90] sm:$0xff]  ;;  %v41_v29 = vld [vmem:[%s288_s1 + $0x88] sm:$0xff]  ;;  %v24_v30 = vld [vmem:[%s288_s1] sm:$0xff] }
  0x14   :  { %65 = vmatpush.msra.mxu0 %v30_v18  ;;  %v40_v31 = vld [vmem:[%s288_s1 + $0x80] sm:$0xff]  ;;  %v23_v33 = vld [vmem:[%s287_s0 + $0x8] sm:$0xff] }
  0x15   :  { %85 = vmatpush.msra.mxu1 %v46_v19  ;;  %v22_v32 = vld [vmem:[%s287_s0] sm:$0xff]  ;;  %s155_s0 = smov [#allocation3]  }
  0x16   :  { %66 = vmatpush.msra.mxu0 %v29_v20  ;;  %v21_v36 = vld [vmem:[#allocation2] sm:$0xff]  ;;  %s114_s27 = sshll.u32 %s155_s0, 4  ;;  %s115_s27 = int_to_ptr.vmem [resolvable:$true] %s114_s27 }
  0x17   :  { %86 = vmatpush.msra.mxu1 %v45_v21  ;;  %v127_v40 = vld [vmem:[%s289_s2] ss:$0 sm:$0xff] }
  0x18   :  { %67 = vmatpush.msra.mxu0 %v28_v22 }
  0x19   :  { %87 = vmatpush.msra.mxu1 %v44_v23 }
  0x1a   :  { %68 = vmatpush.msra.mxu0 %v27_v24 }
  0x1b   :  { %88 = vmatpush.msra.mxu1 %v43_v25 }
  0x1c   :  { %69 = vmatpush.msra.mxu0 %v26_v26 }
  0x1d   :  { %89 = vmatpush.msra.mxu1 %v42_v27 }
  0x1e   :  { %70 = vmatpush.msra.mxu0 %v25_v28 }
  0x1f   :  { %90 = vmatpush.msra.mxu1 %v41_v29 }
  0x20   :  { %71 = vmatpush.msra.mxu0 %v24_v30 }
  0x21   :  { %91 = vmatpush.msra.mxu1 %v40_v31  ;;  %72 = vmatmul.f32.vlgmr.msra.gmra.mxu0 %v22_v32 }
  0x22   :  { %92 = vmatmul.f32.vlgmr.msra.gmra.mxu1 %v23_v33 }
  0x9e   :  { %v73_v35 = vpop.f32.mrf.mxu0 }
  0x9f   :  { %v93_v37 = vpop.f32.mrf.mxu1 }
  0xa0   :  { %v94_v38 = vadd.f32 %v93_v37, %v73_v35 }
  0xa2   :  { %v96_v39 = vadd.f32 %v94_v38, %v21_v36 }
  0xa4   :  { %98 = vst.msk [vmem:[#allocation2] sm:$0xff] %vm19_vm0, %v96_v39 }
  0xab   :  { %v102_v41 = vld [vmem:[#allocation2] sm:$0xff] }
  0xac   :  { %v107_v42 = vmul.f32 %v127_v40, %v102_v41 }
  0xae   :  { %108 = vst.msk [vmem:[#allocation3] sm:$0xff] %vm19_vm0, %v107_v42 }
  0xaf   :  { %119 = dma.vmem_to_hbm [thread:$0]  %s115_s27, 128, %s117_s30, [#allocation4]  }
  0xb0   :  { %152 = dma.done.wait [#allocation4], 128  }
  0xb1   :  { %153 = vsyncadd [#allocation4], 4294967168 }
  0xb2   :  { %124 = vsyncpa [#allocation4], 1 }

// kernel: tpu_custom_call.1
= control target key start
LH: loop header
LB: loop body
LE: loop exit
PB: predicated region body
PF: predicated region fallthrough
CT: control target
= control target key end

     0   :  { %s287_s0 = inlined_call_operand.vmem [shape: f32[8,256], index: 0, kind: input, shape index: {}]   ;;  %s288_s1 = inlined_call_operand.vmem [shape: f32[256,16], index: 1, kind: input, shape index: {}]   ;;  %s289_s2 = inlined_call_operand.vmem [shape: f32[1,16], index: 2, kind: input, shape index: {}]   ;;  %s290_s3 = inlined_call_operand.hbm [shape: f32[8,16], index: 3, kind: output, shape index: {}]  }
   0x1   :  { %v39_v0 = vld [vmem:[%s288_s1 + $0x78] sm:$0xff]  ;;  %v38_v2 = vld [vmem:[%s288_s1 + $0x70] sm:$0xff]  ;;  %v37_v4 = vld [vmem:[%s288_s1 + $0x68] sm:$0xff] }
   0x2   :  { %v55_v1 = vld [vmem:[%s288_s1 + $0xf8] sm:$0xff]  ;;  %56 = vmatpush.msra.mxu0 %v39_v0  ;;  %v54_v3 = vld [vmem:[%s288_s1 + $0xf0] sm:$0xff]  ;;  %v53_v5 = vld [vmem:[%s288_s1 + $0xe8] sm:$0xff] }
   0x3   :  { %76 = vmatpush.msra.mxu1 %v55_v1  ;;  %v36_v6 = vld [vmem:[%s288_s1 + $0x60] sm:$0xff]  ;;  %v35_v8 = vld [vmem:[%s288_s1 + $0x58] sm:$0xff]  ;;  %v34_v10 = vld [vmem:[%s288_s1 + $0x50] sm:$0xff] }
   0x4   :  { %57 = vmatpush.msra.mxu0 %v38_v2  ;;  %v52_v7 = vld [vmem:[%s288_s1 + $0xe0] sm:$0xff]  ;;  %v51_v9 = vld [vmem:[%s288_s1 + $0xd8] sm:$0xff]  ;;  %v50_v11 = vld [vmem:[%s288_s1 + $0xd0] sm:$0xff] }
   0x5   :  { %77 = vmatpush.msra.mxu1 %v54_v3  ;;  %v33_v12 = vld [vmem:[%s288_s1 + $0x48] sm:$0xff] }
   0x6   :  { %58 = vmatpush.msra.mxu0 %v37_v4  ;;  %v49_v13 = vld [vmem:[%s288_s1 + $0xc8] sm:$0xff] }
   0x7   :  { %78 = vmatpush.msra.mxu1 %v53_v5 }
   0x8   :  { %59 = vmatpush.msra.mxu0 %v36_v6 }
   0x9   :  { %79 = vmatpush.msra.mxu1 %v52_v7 }
   0xa   :  { %60 = vmatpush.msra.mxu0 %v35_v8 }
   0xb   :  { %80 = vmatpush.msra.mxu1 %v51_v9 }
   0xc   :  { %61 = vmatpush.msra.mxu0 %v34_v10 }
   0xd   :  { %81 = vmatpush.msra.mxu1 %v50_v11 }
   0xe   :  { %8 = vsyncpa [#allocation4], 0  ;;  %v32_v14 = vld [vmem:[%s288_s1 + $0x40] sm:$0xff]  ;;  %62 = vmatpush.msra.mxu0 %v33_v12  ;;  %v31_v16 = vld [vmem:[%s288_s1 + $0x38] sm:$0xff]  ;;  %vm19_vm0 = vcmask 130048   ;;  %v154_v34 = vmov 0.0  }
   0xf   :  { %v48_v15 = vld [vmem:[%s288_s1 + $0xc0] sm:$0xff]  ;;  %82 = vmatpush.msra.mxu1 %v49_v13  ;;  %v47_v17 = vld [vmem:[%s288_s1 + $0xb8] sm:$0xff]  ;;  %v30_v18 = vld [vmem:[%s288_s1 + $0x30] sm:$0xff]  ;;  %20 = vst.msk [vmem:[#allocation2] sm:$0xff] %vm19_vm0, %v154_v34  ;;  %s116_s30 = sshll.u32 %s290_s3, 4  ;;  %s117_s30 = int_to_ptr.hbm [resolvable:$true] %s116_s30 }
  0x10   :  { %63 = vmatpush.msra.mxu0 %v32_v14  ;;  %v46_v19 = vld [vmem:[%s288_s1 + $0xb0] sm:$0xff]  ;;  %v29_v20 = vld [vmem:[%s288_s1 + $0x28] sm:$0xff]  ;;  %v28_v22 = vld [vmem:[%s288_s1 + $0x20] sm:$0xff] }
  0x11   :  { %83 = vmatpush.msra.mxu1 %v48_v15  ;;  %v45_v21 = vld [vmem:[%s288_s1 + $0xa8] sm:$0xff]  ;;  %v44_v23 = vld [vmem:[%s288_s1 + $0xa0] sm:$0xff]  ;;  %v27_v24 = vld [vmem:[%s288_s1 + $0x18] sm:$0xff] }
  0x12   :  { %64 = vmatpush.msra.mxu0 %v31_v16  ;;  %v43_v25 = vld [vmem:[%s288_s1 + $0x98] sm:$0xff]  ;;  %v26_v26 = vld [vmem:[%s288_s1 + $0x10] sm:$0xff]  ;;  %v25_v28 = vld [vmem:[%s288_s1 + $0x8] sm:$0xff] }
  0x13   :  { %84 = vmatpush.msra.mxu1 %v47_v17  ;;  %v42_v27 = vld [vmem:[%s288_s1 + $0x90] sm:$0xff]  ;;  %v41_v29 = vld [vmem:[%s288_s1 + $0x88] sm:$0xff]  ;;  %v24_v30 = vld [vmem:[%s288_s1] sm:$0xff] }
  0x14   :  { %65 = vmatpush.msra.mxu0 %v30_v18  ;;  %v40_v31 = vld [vmem:[%s288_s1 + $0x80] sm:$0xff]  ;;  %v23_v33 = vld [vmem:[%s287_s0 + $0x8] sm:$0xff] }
  0x15   :  { %85 = vmatpush.msra.mxu1 %v46_v19  ;;  %v22_v32 = vld [vmem:[%s287_s0] sm:$0xff]  ;;  %s155_s0 = smov [#allocation3]  }
  0x16   :  { %66 = vmatpush.msra.mxu0 %v29_v20  ;;  %v21_v36 = vld [vmem:[#allocation2] sm:$0xff]  ;;  %s114_s27 = sshll.u32 %s155_s0, 4  ;;  %s115_s27 = int_to_ptr.vmem [resolvable:$true] %s114_s27 }
  0x17   :  { %86 = vmatpush.msra.mxu1 %v45_v21  ;;  %v127_v40 = vld [vmem:[%s289_s2] ss:$0 sm:$0xff] }
  0x18   :  { %67 = vmatpush.msra.mxu0 %v28_v22 }
  0x19   :  { %87 = vmatpush.msra.mxu1 %v44_v23 }
  0x1a   :  { %68 = vmatpush.msra.mxu0 %v27_v24 }
  0x1b   :  { %88 = vmatpush.msra.mxu1 %v43_v25 }
  0x1c   :  { %69 = vmatpush.msra.mxu0 %v26_v26 }
  0x1d   :  { %89 = vmatpush.msra.mxu1 %v42_v27 }
  0x1e   :  { %70 = vmatpush.msra.mxu0 %v25_v28 }
  0x1f   :  { %90 = vmatpush.msra.mxu1 %v41_v29 }
  0x20   :  { %71 = vmatpush.msra.mxu0 %v24_v30 }
  0x21   :  { %91 = vmatpush.msra.mxu1 %v40_v31  ;;  %72 = vmatmul.f32.vlgmr.msra.gmra.mxu0 %v22_v32 }
  0x22   :  { %92 = vmatmul.f32.vlgmr.msra.gmra.mxu1 %v23_v33 }
  0x9e   :  { %v73_v35 = vpop.f32.mrf.mxu0 }
  0x9f   :  { %v93_v37 = vpop.f32.mrf.mxu1 }
  0xa0   :  { %v94_v38 = vadd.f32 %v93_v37, %v73_v35 }
  0xa2   :  { %v96_v39 = vadd.f32 %v94_v38, %v21_v36 }
  0xa4   :  { %98 = vst.msk [vmem:[#allocation2] sm:$0xff] %vm19_vm0, %v96_v39 }
  0xab   :  { %v102_v41 = vld [vmem:[#allocation2] sm:$0xff] }
  0xac   :  { %v107_v42 = vmul.f32 %v127_v40, %v102_v41 }
  0xae   :  { %108 = vst.msk [vmem:[#allocation3] sm:$0xff] %vm19_vm0, %v107_v42 }
  0xaf   :  { %119 = dma.vmem_to_hbm [thread:$0]  %s115_s27, 128, %s117_s30, [#allocation4]  }
  0xb0   :  { %152 = dma.done.wait [#allocation4], 128  }
  0xb1   :  { %153 = vsyncadd [#allocation4], 4294967168 }
  0xb2   :  { %124 = vsyncpa [#allocation4], 1 }

</bundles_post_ra>
